<compile_context>
chip_gen: v7x
topology: tpu7x:2x2x1
jax: 0.10.0
libtpu: 0.0.40
codegen_flags: <defaults>
</compile_context>

<pallas_src>
import jax
import jax.numpy as jnp
from jax.experimental import pallas as pl
from jax.experimental.pallas import tpu as pltpu


def _round_up(x, m):
    return (x + m - 1) // m * m


# ---------------------------------------------------------------------------
# Layer 1 kernel:  h = relu( (A @ x) @ W1l + x @ W1r + b1 ),  p = h @ W2l
# Grid: (node-row tiles i, contraction tiles k over A's columns).
# ---------------------------------------------------------------------------
def sage1_kernel(a_ref, x_agg_ref, x_self_ref, w1l_ref, w1r_ref, b1_ref,
                 w2l_ref, h_ref, p_ref, acc_ref):
    k = pl.program_id(1)

    @pl.when(k == 0)
    def _():
        acc_ref[...] = jnp.zeros_like(acc_ref)

    # mean-neighbor aggregation: bf16 operands, f32 MXU accumulation
    acc_ref[...] += jnp.dot(a_ref[...], x_agg_ref[...],
                            preferred_element_type=jnp.float32)

    @pl.when(k == pl.num_programs(1) - 1)
    def _():
        agg = acc_ref[...].astype(jnp.bfloat16)
        h = (jnp.dot(agg, w1l_ref[...], preferred_element_type=jnp.float32)
             + jnp.dot(x_self_ref[...], w1r_ref[...],
                       preferred_element_type=jnp.float32)
             + b1_ref[...])                       # bias + ReLU in f32
        h = jnp.maximum(h, 0.0)
        h_bf = h.astype(jnp.bfloat16)
        h_ref[...] = h_bf
        # project-before-aggregate for layer 2
        p_ref[...] = jnp.dot(h_bf, w2l_ref[...],
                             preferred_element_type=jnp.float32).astype(p_ref.dtype)


# ---------------------------------------------------------------------------
# Layer 2 kernel:  out = A @ p + h @ W2r + b2        (p == relu(h) @ W2l)
# ---------------------------------------------------------------------------
def sage2_kernel(a_ref, p_ref, h_self_ref, w2r_ref, b2_ref, o_ref, acc_ref):
    k = pl.program_id(1)

    @pl.when(k == 0)
    def _():
        acc_ref[...] = jnp.zeros_like(acc_ref)

    acc_ref[...] += jnp.dot(a_ref[...], p_ref[...],
                            preferred_element_type=jnp.float32)

    @pl.when(k == pl.num_programs(1) - 1)
    def _():
        out = (acc_ref[...]
               + jnp.dot(h_self_ref[...], w2r_ref[...],
                         preferred_element_type=jnp.float32)
               + b2_ref[...])
        o_ref[...] = out.astype(o_ref.dtype)


# ---------------------------------------------------------------------------
# Plain-JAX glue: dense row-normalized adjacency  A[dst, src] = 1/deg(dst).
# ---------------------------------------------------------------------------
def build_norm_adjacency(edge_index, num_nodes):
    src, dst = edge_index[0], edge_index[1]
    a = jnp.zeros((num_nodes, num_nodes), jnp.float32)
    a = a.at[dst, src].add(1.0)
    deg = jnp.clip(a.sum(axis=1, keepdims=True), 1.0, None)
    return a / deg


def graphsage_forward(x, edge_index, params):
    n, cin = x.shape
    hid = params["w1l"].shape[1]
    cout = params["w2l"].shape[1]

    # --- padded sizes: lane-dense (128) channels, tile-aligned node dim ------
    cin_p = _round_up(cin, 128)
    hid_p = _round_up(hid, 128)
    cout_p = _round_up(cout, 128)

    if n <= 1024:                     # toy / small graphs: single tile each way
        n_pad = _round_up(n, 128)
        tm = tk = n_pad
    else:                             # stream A in (tm, tk) bf16 tiles
        tm, tk = 256, 512
        n_pad = _round_up(n, 512)
    grid = (n_pad // tm, n_pad // tk)

    # --- build + pad operands (zeros in padding keep the math exact) --------
    a = build_norm_adjacency(edge_index, n)
    a = jnp.pad(a, ((0, n_pad - n), (0, n_pad - n))).astype(jnp.bfloat16)
    x_p = jnp.pad(x, ((0, n_pad - n), (0, cin_p - cin))).astype(jnp.bfloat16)

    w1l = jnp.pad(params["w1l"], ((0, cin_p - cin), (0, hid_p - hid))).astype(jnp.bfloat16)
    w1r = jnp.pad(params["w1r"], ((0, cin_p - cin), (0, hid_p - hid))).astype(jnp.bfloat16)
    b1 = jnp.pad(params["b1"], ((0, 0), (0, hid_p - hid))).astype(jnp.float32)
    w2l = jnp.pad(params["w2l"], ((0, hid_p - hid), (0, cout_p - cout))).astype(jnp.bfloat16)
    w2r = jnp.pad(params["w2r"], ((0, hid_p - hid), (0, cout_p - cout))).astype(jnp.bfloat16)
    b2 = jnp.pad(params["b2"], ((0, 0), (0, cout_p - cout))).astype(jnp.float32)

    cparams = pltpu.CompilerParams(
        dimension_semantics=("parallel", "arbitrary"),
        vmem_limit_bytes=32 * 1024 * 1024,
    )
    const = lambda i, k: (0, 0)   # grid-resident weights/bias: never re-DMA'd

    # ---- layer 1: h = relu(SAGEConv1(x)),  p = h @ W2l ----------------------
    h_bf, p_bf = pl.pallas_call(
        sage1_kernel,
        grid=grid,
        in_specs=[
            pl.BlockSpec((tm, tk), lambda i, k: (i, k)),      # A tile
            pl.BlockSpec((tk, cin_p), lambda i, k: (k, 0)),   # x rows (aggregation)
            pl.BlockSpec((tm, cin_p), lambda i, k: (i, 0)),   # x rows (self / root)
            pl.BlockSpec((cin_p, hid_p), const),              # W1l
            pl.BlockSpec((cin_p, hid_p), const),              # W1r
            pl.BlockSpec((1, hid_p), const),                  # b1
            pl.BlockSpec((hid_p, cout_p), const),             # W2l (fused projection)
        ],
        out_specs=[
            pl.BlockSpec((tm, hid_p), lambda i, k: (i, 0)),   # h   (bf16)
            pl.BlockSpec((tm, cout_p), lambda i, k: (i, 0)),  # p = h @ W2l (bf16)
        ],
        out_shape=[
            jax.ShapeDtypeStruct((n_pad, hid_p), jnp.bfloat16),
            jax.ShapeDtypeStruct((n_pad, cout_p), jnp.bfloat16),
        ],
        scratch_shapes=[pltpu.VMEM((tm, cin_p), jnp.float32)],
        compiler_params=cparams,
    )(a, x_p, x_p, w1l, w1r, b1, w2l)

    # ---- layer 2: out = A @ p + h @ W2r + b2 --------------------------------
    out_p = pl.pallas_call(
        sage2_kernel,
        grid=grid,
        in_specs=[
            pl.BlockSpec((tm, tk), lambda i, k: (i, k)),      # A tile
            pl.BlockSpec((tk, cout_p), lambda i, k: (k, 0)),  # p rows (aggregation)
            pl.BlockSpec((tm, hid_p), lambda i, k: (i, 0)),   # h rows (self / root)
            pl.BlockSpec((hid_p, cout_p), const),             # W2r
            pl.BlockSpec((1, cout_p), const),                 # b2
        ],
        out_specs=pl.BlockSpec((tm, cout_p), lambda i, k: (i, 0)),
        out_shape=jax.ShapeDtypeStruct((n_pad, cout_p), jnp.float32),
        scratch_shapes=[pltpu.VMEM((tm, cout_p), jnp.float32)],
        compiler_params=cparams,
    )(a, p_bf, h_bf, w2r, b2)

    return out_p[:n, :cout]


# ---------------------------------------------------------------------------
# Deterministic parameter init (shapes as in SAGEConv.__init__).
# ---------------------------------------------------------------------------
def init_params(key, in_channels, hidden_channels, out_channels):
    def linear_w(k, fan_in, fan_out):
        bound = 1.0 / jnp.sqrt(jnp.float32(fan_in))
        return jax.random.uniform(k, (fan_in, fan_out), jnp.float32, -bound, bound)

    k1, k2, k3, k4, k5, k6 = jax.random.split(key, 6)
    b1_bound = 1.0 / jnp.sqrt(jnp.float32(in_channels))
    b2_bound = 1.0 / jnp.sqrt(jnp.float32(hidden_channels))
    return {
        "w1l": linear_w(k1, in_channels, hidden_channels),
        "w1r": linear_w(k2, in_channels, hidden_channels),
        "b1": jax.random.uniform(k3, (1, hidden_channels), jnp.float32,
                                 -b1_bound, b1_bound),
        "w2l": linear_w(k4, hidden_channels, out_channels),
        "w2r": linear_w(k5, hidden_channels, out_channels),
        "b2": jax.random.uniform(k6, (1, out_channels), jnp.float32,
                                 -b2_bound, b2_bound),
    }


# Pure-JAX f32 reference for correctness.
def reference_forward(x, edge_index, params):
    a = build_norm_adjacency(edge_index, x.shape[0])
    h = (a @ x) @ params["w1l"] + x @ params["w1r"] + params["b1"]
    h = jnp.maximum(h, 0.0)
    return (a @ h) @ params["w2l"] + h @ params["w2r"] + params["b2"]


if __name__ == "__main__":
    in_channels, hidden_channels, out_channels = 16, 32, 8
    num_nodes, num_edges = 8, 24

    key = jax.random.PRNGKey(0)
    k_x, k_e, k_p = jax.random.split(key, 3)

    x = jax.random.normal(k_x, (num_nodes, in_channels), jnp.float32)
    edge_index = jax.random.randint(k_e, (2, num_edges), 0, num_nodes,
                                    dtype=jnp.int32)
    params = init_params(k_p, in_channels, hidden_channels, out_channels)

    out = graphsage_forward(x, edge_index, params)
    out = jax.block_until_ready(out)

    ref = reference_forward(x, edge_index, params)
    assert out.shape == (num_nodes, out_channels)
    # bf16 operands (incl. 1/deg in A) with f32 accumulation -> relaxed tolerance.
    assert jnp.allclose(out, ref, atol=5e-2, rtol=5e-2)

    print("KERNEL_OK")
</pallas_src>

<mosaic_0001>
module attributes {stable_mosaic.version = 11 : i64} {
  func.func @sage1_kernel(%arg0: i32, %arg1: i32, %arg2: memref<128x128xbf16, #tpu.memory_space<vmem>>, %arg3: memref<128x128xbf16, #tpu.memory_space<vmem>>, %arg4: memref<128x128xbf16, #tpu.memory_space<vmem>>, %arg5: memref<128x128xbf16, #tpu.memory_space<vmem>>, %arg6: memref<128x128xbf16, #tpu.memory_space<vmem>>, %arg7: memref<1x128xf32, #tpu.memory_space<vmem>>, %arg8: memref<128x128xbf16, #tpu.memory_space<vmem>>, %arg9: memref<128x128xbf16, #tpu.memory_space<vmem>>, %arg10: memref<128x128xbf16, #tpu.memory_space<vmem>>, %arg11: memref<128x128xf32, #tpu.memory_space<vmem>>) attributes {dimension_semantics = [#tpu.dimension_semantics<parallel>, #tpu.dimension_semantics<arbitrary>], iteration_bounds = array<i64: 1, 1>, scalar_prefetch = 0 : i64, scratch_operands = 1 : i64, tpu.core_type = #tpu.core_type<tc>, window_params = [{transform_indices = @transform_0, window_bounds = array<i64: 128, 128>}, {transform_indices = @transform_1, window_bounds = array<i64: 128, 128>}, {transform_indices = @transform_2, window_bounds = array<i64: 128, 128>}, {pipeline_mode = #tpu.pipeline_mode<synchronous>, transform_indices = @transform_3, window_bounds = array<i64: 128, 128>}, {pipeline_mode = #tpu.pipeline_mode<synchronous>, transform_indices = @transform_4, window_bounds = array<i64: 128, 128>}, {pipeline_mode = #tpu.pipeline_mode<synchronous>, transform_indices = @transform_5, window_bounds = array<i64: 1, 128>}, {pipeline_mode = #tpu.pipeline_mode<synchronous>, transform_indices = @transform_6, window_bounds = array<i64: 128, 128>}, {transform_indices = @transform_7, window_bounds = array<i64: 128, 128>}, {transform_indices = @transform_8, window_bounds = array<i64: 128, 128>}]} {
    %c0_i32 = arith.constant 0 : i32
    %0 = arith.cmpi eq, %arg1, %c0_i32 : i32
    %1 = arith.extui %0 : i1 to i32
    %c0_i32_0 = arith.constant 0 : i32
    %2 = arith.cmpi ne, %1, %c0_i32_0 : i32
    scf.if %2 {
      %cst_10 = arith.constant 0.000000e+00 : f32
      %12 = vector.broadcast %cst_10 : f32 to vector<128x128xf32>
      %c0_11 = arith.constant 0 : index
      %c0_12 = arith.constant 0 : index
      %13 = vector.load %arg11[%c0_11, %c0_12] : memref<128x128xf32, #tpu.memory_space<vmem>>, vector<128x128xf32>
      tpu.vector_store %arg11[%c0_11, %c0_12], %12 {strides = array<i32>} : memref<128x128xf32, #tpu.memory_space<vmem>>, vector<128x128xf32>,
    } else {
    }
    %c0 = arith.constant 0 : index
    %c0_1 = arith.constant 0 : index
    %3 = vector.load %arg11[%c0, %c0_1] : memref<128x128xf32, #tpu.memory_space<vmem>>, vector<128x128xf32>
    %c0_2 = arith.constant 0 : index
    %c0_3 = arith.constant 0 : index
    %4 = vector.load %arg2[%c0_2, %c0_3] : memref<128x128xbf16, #tpu.memory_space<vmem>>, vector<128x128xbf16>
    %c0_4 = arith.constant 0 : index
    %c0_5 = arith.constant 0 : index
    %5 = vector.load %arg3[%c0_4, %c0_5] : memref<128x128xbf16, #tpu.memory_space<vmem>>, vector<128x128xbf16>
    %cst = arith.constant dense<0.000000e+00> : vector<128x128xf32>
    %6 = tpu.matmul %4, %5, %cst {dimension_numbers = #tpu.dot_dimension_numbers<[1], [0], [0], [1], [0, 0, 1, 1], [], []>} : vector<128x128xbf16>, vector<128x128xbf16>, vector<128x128xf32> -> vector<128x128xf32>
    %7 = arith.addf %3, %6 : vector<128x128xf32>
    %c0_6 = arith.constant 0 : index
    %c0_7 = arith.constant 0 : index
    %8 = vector.load %arg11[%c0_6, %c0_7] : memref<128x128xf32, #tpu.memory_space<vmem>>, vector<128x128xf32>
    tpu.vector_store %arg11[%c0_6, %c0_7], %7 {strides = array<i32>} : memref<128x128xf32, #tpu.memory_space<vmem>>, vector<128x128xf32>,
    %c0_i32_8 = arith.constant 0 : i32
    %9 = arith.cmpi eq, %arg1, %c0_i32_8 : i32
    %10 = arith.extui %9 : i1 to i32
    %c0_i32_9 = arith.constant 0 : i32
    %11 = arith.cmpi ne, %10, %c0_i32_9 : i32
    scf.if %11 {
      %c0_10 = arith.constant 0 : index
      %c0_11 = arith.constant 0 : index
      %12 = vector.load %arg11[%c0_10, %c0_11] : memref<128x128xf32, #tpu.memory_space<vmem>>, vector<128x128xf32>
      %13 = arith.truncf %12 : vector<128x128xf32> to vector<128x128xbf16>
      %c0_12 = arith.constant 0 : index
      %c0_13 = arith.constant 0 : index
      %14 = vector.load %arg5[%c0_12, %c0_13] : memref<128x128xbf16, #tpu.memory_space<vmem>>, vector<128x128xbf16>
      %cst_14 = arith.constant dense<0.000000e+00> : vector<128x128xf32>
      %15 = tpu.matmul %13, %14, %cst_14 {dimension_numbers = #tpu.dot_dimension_numbers<[1], [0], [0], [1], [0, 0, 1, 1], [], []>} : vector<128x128xbf16>, vector<128x128xbf16>, vector<128x128xf32> -> vector<128x128xf32>
      %c0_15 = arith.constant 0 : index
      %c0_16 = arith.constant 0 : index
      %16 = vector.load %arg4[%c0_15, %c0_16] : memref<128x128xbf16, #tpu.memory_space<vmem>>, vector<128x128xbf16>
      %c0_17 = arith.constant 0 : index
      %c0_18 = arith.constant 0 : index
      %17 = vector.load %arg6[%c0_17, %c0_18] : memref<128x128xbf16, #tpu.memory_space<vmem>>, vector<128x128xbf16>
      %cst_19 = arith.constant dense<0.000000e+00> : vector<128x128xf32>
      %18 = tpu.matmul %16, %17, %cst_19 {dimension_numbers = #tpu.dot_dimension_numbers<[1], [0], [0], [1], [0, 0, 1, 1], [], []>} : vector<128x128xbf16>, vector<128x128xbf16>, vector<128x128xf32> -> vector<128x128xf32>
      %19 = arith.addf %15, %18 : vector<128x128xf32>
      %c0_20 = arith.constant 0 : index
      %c0_21 = arith.constant 0 : index
      %20 = vector.load %arg7[%c0_20, %c0_21] : memref<1x128xf32, #tpu.memory_space<vmem>>, vector<1x128xf32>
      %21 = vector.broadcast %20 : vector<1x128xf32> to vector<128x128xf32>
      %22 = arith.addf %19, %21 : vector<128x128xf32>
      %cst_22 = arith.constant 0.000000e+00 : f32
      %23 = vector.broadcast %cst_22 : f32 to vector<128x128xf32>
      %24 = arith.maximumf %22, %23 : vector<128x128xf32>
      %25 = arith.truncf %24 : vector<128x128xf32> to vector<128x128xbf16>
      %c0_23 = arith.constant 0 : index
      %c0_24 = arith.constant 0 : index
      %26 = vector.load %arg9[%c0_23, %c0_24] : memref<128x128xbf16, #tpu.memory_space<vmem>>, vector<128x128xbf16>
      tpu.vector_store %arg9[%c0_23, %c0_24], %25 {strides = array<i32>} : memref<128x128xbf16, #tpu.memory_space<vmem>>, vector<128x128xbf16>,
      %c0_25 = arith.constant 0 : index
      %c0_26 = arith.constant 0 : index
      %27 = vector.load %arg8[%c0_25, %c0_26] : memref<128x128xbf16, #tpu.memory_space<vmem>>, vector<128x128xbf16>
      %cst_27 = arith.constant dense<0.000000e+00> : vector<128x128xf32>
      %28 = tpu.matmul %25, %27, %cst_27 {dimension_numbers = #tpu.dot_dimension_numbers<[1], [0], [0], [1], [0, 0, 1, 1], [], []>} : vector<128x128xbf16>, vector<128x128xbf16>, vector<128x128xf32> -> vector<128x128xf32>
      %29 = arith.truncf %28 : vector<128x128xf32> to vector<128x128xbf16>
      %c0_28 = arith.constant 0 : index
      %c0_29 = arith.constant 0 : index
      %30 = vector.load %arg10[%c0_28, %c0_29] : memref<128x128xbf16, #tpu.memory_space<vmem>>, vector<128x128xbf16>
      tpu.vector_store %arg10[%c0_28, %c0_29], %29 {strides = array<i32>} : memref<128x128xbf16, #tpu.memory_space<vmem>>, vector<128x128xbf16>,
    } else {
    }
    return
  }
  func.func @transform_0(%arg0: i32, %arg1: i32) -> (i32, i32) {
    %c0_i32 = arith.constant 0 : i32
    return %arg0, %arg1 : i32, i32
  }
  func.func @transform_1(%arg0: i32, %arg1: i32) -> (i32, i32) {
    %c0_i32 = arith.constant 0 : i32
    %c0_i32_0 = arith.constant 0 : i32
    return %arg1, %c0_i32 : i32, i32
  }
  func.func @transform_2(%arg0: i32, %arg1: i32) -> (i32, i32) {
    %c0_i32 = arith.constant 0 : i32
    %c0_i32_0 = arith.constant 0 : i32
    return %arg0, %c0_i32 : i32, i32
  }
  func.func @transform_3(%arg0: i32, %arg1: i32) -> (i32, i32) {
    %c0_i32 = arith.constant 0 : i32
    %c0_i32_0 = arith.constant 0 : i32
    %c0_i32_1 = arith.constant 0 : i32
    return %c0_i32, %c0_i32_0 : i32, i32
  }
  func.func @transform_4(%arg0: i32, %arg1: i32) -> (i32, i32) {
    %c0_i32 = arith.constant 0 : i32
    %c0_i32_0 = arith.constant 0 : i32
    %c0_i32_1 = arith.constant 0 : i32
    return %c0_i32, %c0_i32_0 : i32, i32
  }
  func.func @transform_5(%arg0: i32, %arg1: i32) -> (i32, i32) {
    %c0_i32 = arith.constant 0 : i32
    %c0_i32_0 = arith.constant 0 : i32
    %c0_i32_1 = arith.constant 0 : i32
    return %c0_i32, %c0_i32_0 : i32, i32
  }
  func.func @transform_6(%arg0: i32, %arg1: i32) -> (i32, i32) {
    %c0_i32 = arith.constant 0 : i32
    %c0_i32_0 = arith.constant 0 : i32
    %c0_i32_1 = arith.constant 0 : i32
    return %c0_i32, %c0_i32_0 : i32, i32
  }
  func.func @transform_7(%arg0: i32, %arg1: i32) -> (i32, i32) {
    %c0_i32 = arith.constant 0 : i32
    %c0_i32_0 = arith.constant 0 : i32
    return %arg0, %c0_i32 : i32, i32
  }
  func.func @transform_8(%arg0: i32, %arg1: i32) -> (i32, i32) {
    %c0_i32 = arith.constant 0 : i32
    %c0_i32_0 = arith.constant 0 : i32
    return %arg0, %c0_i32 : i32, i32
  }
}

</mosaic_0001>

<bundles_post_ra>
// kernel: tpu_custom_call.1
= control target key start
LH: loop header
LB: loop body
LE: loop exit
PB: predicated region body
PF: predicated region fallthrough
CT: control target
= control target key end

     0   :  { %14 = vsyncpa [#allocation4], 0  ;;  %s2075_s0 = inlined_call_operand.hbm [shape: bf16[128,128], index: 0, kind: input, shape index: {}]   ;;  %s2076_s1 = inlined_call_operand.hbm [shape: bf16[128,128], index: 1, kind: input, shape index: {}]   ;;  %s2077_s2 = inlined_call_operand.hbm [shape: bf16[128,128], index: 2, kind: input, shape index: {}]   ;;  %s2078_s3 = inlined_call_operand.hbm [shape: bf16[128,128], index: 3, kind: input, shape index: {}]   ;;  %s2079_s4 = inlined_call_operand.hbm [shape: bf16[128,128], index: 4, kind: input, shape index: {}]   ;;  %s2080_s5 = inlined_call_operand.vmem [shape: f32[1,128], index: 5, kind: input, shape index: {}]   ;;  %s2081_s6 = inlined_call_operand.hbm [shape: bf16[128,128], index: 6, kind: input, shape index: {}]   ;;  %s2082_s7 = inlined_call_operand.hbm [shape: bf16[128,128], index: 7, kind: output, shape index: {0}]   ;;  %s2083_s8 = inlined_call_operand.hbm [shape: bf16[128,128], index: 8, kind: output, shape index: {1}]  }
   0x1   :  { %15 = vsyncpa [#allocation7], 0 }
   0x2   :  { %16 = vsyncpa [#allocation10], 0 }
   0x3   :  { %17 = vsyncpa [#allocation13], 0 }
   0x4   :  { %18 = vsyncpa [#allocation5], 0 }
   0x5   :  { %19 = vsyncpa [#allocation16], 0  ;;  %s1876_s27 = smov [#allocation6]   ;;  %s1877_s29 = smov [#allocation9]  }
   0x6   :  { %s37_s28 = sshll.u32 %s1876_s27, 4  ;;  %s61_s30 = sshll.u32 %s1877_s29, 4  ;;  %s38_s28 = int_to_ptr.vmem [resolvable:$true] %s37_s28  ;;  %s1931_s30 = int_to_ptr.vmem [resolvable:$true] %s61_s30 }
   0x7   :  { %s1688_s11 = scalar_lea.hbm %s2076_s1, 1024 }
   0x8   :  { %p1689_p0 = scmp.ne.s32.totalorder %s2076_s1, %s1688_s11  ;;  %p1692_p1 = scmp.lt.u32.totalorder %s1688_s11, %s2076_s1 }
   0xa   :  { %p1694_p2 = pnand %p1692_p1, %p1689_p0 }
   0xc   :  { %1697 = shalt.err (!%p1694_p2)
}
   0xd   :  { %s1698_s16 = scalar_lea.vmem %s38_s28, 1024  ;;  %p1703_p4 = scmp.lt.s32.totalorder %s38_s28, %s38_s28 }
   0xe   :  { %p1699_p3 = scmp.ne.s32.totalorder %s38_s28, %s1698_s16  ;;  %p1704_p5 = scmp.lt.s32.totalorder %s1698_s16, %s1698_s16 }
  0x10   :  { %p1705_p6 = por %p1704_p5, %p1703_p4 }
  0x12   :  { %p1706_p7 = pnand %p1705_p6, %p1699_p3 }
  0x14   :  { %1709 = shalt.err (!%p1706_p7)
}
  0x15   :  { %s1878_s17 = smov 64   ;;  %s1879_s18 = smov 4  }
  0x16   :  { %43 = dma.hbm_to_vmem [thread:$0]  %s2076_s1, 1024, %s38_s28, [#allocation7], %s1878_s17, %s1878_s17, %s1879_s18  }
  0x17   :  { %s1710_s23 = scalar_lea.hbm %s2078_s3, 1024 }
  0x18   :  { %p1711_p8 = scmp.ne.s32.totalorder %s2078_s3, %s1710_s23  ;;  %p1714_p9 = scmp.lt.u32.totalorder %s1710_s23, %s2078_s3 }
  0x1a   :  { %p1716_p10 = pnand %p1714_p9, %p1711_p8 }
  0x1c   :  { %1719 = shalt.err (!%p1716_p10)
}
  0x1d   :  { %s1720_s29 = scalar_lea.vmem %s1931_s30, 1024  ;;  %p1725_p12 = scmp.lt.s32.totalorder %s1931_s30, %s1931_s30 }
  0x1e   :  { %p1721_p11 = scmp.ne.s32.totalorder %s1931_s30, %s1720_s29  ;;  %p1726_p13 = scmp.lt.s32.totalorder %s1720_s29, %s1720_s29 }
  0x20   :  { %p1727_p0 = por %p1726_p13, %p1725_p12 }
  0x22   :  { %p1728_p1 = pnand %p1727_p0, %p1721_p11 }
  0x24   :  { %1731 = shalt.err (!%p1728_p1)
}
  0x25   :  { %67 = dma.hbm_to_vmem [thread:$0]  %s2078_s3, 1024, %s1931_s30, [#allocation10], %s1878_s17, %s1878_s17, %s1879_s18  }
  0x26   :  { %s1880_s9 = smov [#allocation3]   ;;  %s1881_s11 = smov [#allocation8]  }
  0x27   :  { %s25_s10 = sshll.u32 %s1880_s9, 4  ;;  %s49_s12 = sshll.u32 %s1881_s11, 4  ;;  %s26_s10 = int_to_ptr.vmem [resolvable:$true] %s25_s10  ;;  %s1968_s12 = int_to_ptr.vmem [resolvable:$true] %s49_s12 }
  0x28   :  { %s1732_s15 = scalar_lea.hbm %s2075_s0, 1024 }
  0x29   :  { %p1733_p2 = scmp.ne.s32.totalorder %s2075_s0, %s1732_s15  ;;  %p1736_p3 = scmp.lt.u32.totalorder %s1732_s15, %s2075_s0 }
  0x2b   :  { %p1738_p4 = pnand %p1736_p3, %p1733_p2 }
  0x2d   :  { %1741 = shalt.err (!%p1738_p4)
}
  0x2e   :  { %s1742_s3 = scalar_lea.vmem %s26_s10, 1024  ;;  %p1747_p6 = scmp.lt.s32.totalorder %s26_s10, %s26_s10 }
  0x2f   :  { %p1743_p5 = scmp.ne.s32.totalorder %s26_s10, %s1742_s3  ;;  %p1748_p7 = scmp.lt.s32.totalorder %s1742_s3, %s1742_s3 }
  0x31   :  { %p1749_p8 = por %p1748_p7, %p1747_p6 }
  0x33   :  { %p1750_p9 = pnand %p1749_p8, %p1743_p5 }
  0x35   :  { %1753 = shalt.err (!%p1750_p9)
}
  0x36   :  { %31 = dma.hbm_to_vmem [thread:$0]  %s2075_s0, 1024, %s26_s10, [#allocation4], %s1878_s17, %s1878_s17, %s1879_s18  }
  0x37   :  { %s1754_s25 = scalar_lea.hbm %s2077_s2, 1024 }
  0x38   :  { %p1755_p10 = scmp.ne.s32.totalorder %s2077_s2, %s1754_s25  ;;  %p1758_p11 = scmp.lt.u32.totalorder %s1754_s25, %s2077_s2 }
  0x3a   :  { %p1760_p12 = pnand %p1758_p11, %p1755_p10 }
  0x3c   :  { %1763 = shalt.err (!%p1760_p12)
}
  0x3d   :  { %s1764_s28 = scalar_lea.vmem %s1968_s12, 1024  ;;  %p1769_p0 = scmp.lt.s32.totalorder %s1968_s12, %s1968_s12 }
  0x3e   :  { %p1765_p13 = scmp.ne.s32.totalorder %s1968_s12, %s1764_s28  ;;  %p1770_p1 = scmp.lt.s32.totalorder %s1764_s28, %s1764_s28 }
  0x40   :  { %p1771_p2 = por %p1770_p1, %p1769_p0 }
  0x42   :  { %p1772_p3 = pnand %p1771_p2, %p1765_p13 }
  0x44   :  { %1775 = shalt.err (!%p1772_p3)
}
  0x45   :  { %55 = dma.hbm_to_vmem [thread:$0]  %s2077_s2, 1024, %s1968_s12, [#allocation7], %s1878_s17, %s1878_s17, %s1879_s18  }
  0x46   :  { %s1882_s10 = smov [#allocation11]   ;;  %s1883_s13 = smov [#allocation12]  }
  0x47   :  { %s73_s11 = sshll.u32 %s1882_s10, 4  ;;  %s87_s14 = sshll.u32 %s1883_s13, 4  ;;  %s74_s11 = int_to_ptr.vmem [resolvable:$true] %s73_s11  ;;  %s2005_s14 = int_to_ptr.vmem [resolvable:$true] %s87_s14 }
  0x48   :  { %s1776_s19 = scalar_lea.hbm %s2079_s4, 1024 }
  0x49   :  { %p1777_p4 = scmp.ne.s32.totalorder %s2079_s4, %s1776_s19  ;;  %p1780_p5 = scmp.lt.u32.totalorder %s1776_s19, %s2079_s4 }
  0x4b   :  { %p1782_p6 = pnand %p1780_p5, %p1777_p4 }
  0x4d   :  { %1785 = shalt.err (!%p1782_p6)
}
  0x4e   :  { %s1786_s2 = scalar_lea.vmem %s74_s11, 1024  ;;  %p1791_p8 = scmp.lt.s32.totalorder %s74_s11, %s74_s11 }
  0x4f   :  { %p1787_p7 = scmp.ne.s32.totalorder %s74_s11, %s1786_s2  ;;  %p1792_p9 = scmp.lt.s32.totalorder %s1786_s2, %s1786_s2 }
  0x51   :  { %p1793_p10 = por %p1792_p9, %p1791_p8 }
  0x53   :  { %p1794_p11 = pnand %p1793_p10, %p1787_p7 }
  0x55   :  { %1797 = shalt.err (!%p1794_p11)
}
  0x56   :  { %79 = dma.hbm_to_vmem [thread:$0]  %s2079_s4, 1024, %s74_s11, [#allocation10], %s1878_s17, %s1878_s17, %s1879_s18  }
  0x57   :  { %s1798_s25 = scalar_lea.hbm %s2081_s6, 1024 }
  0x58   :  { %p1799_p12 = scmp.ne.s32.totalorder %s2081_s6, %s1798_s25  ;;  %p1802_p13 = scmp.lt.u32.totalorder %s1798_s25, %s2081_s6 }
  0x5a   :  { %p1804_p0 = pnand %p1802_p13, %p1799_p12 }
  0x5c   :  { %1807 = shalt.err (!%p1804_p0)
}
  0x5d   :  { %s1808_s28 = scalar_lea.vmem %s2005_s14, 1024  ;;  %p1813_p2 = scmp.lt.s32.totalorder %s2005_s14, %s2005_s14 }
  0x5e   :  { %p1809_p1 = scmp.ne.s32.totalorder %s2005_s14, %s1808_s28  ;;  %p1814_p3 = scmp.lt.s32.totalorder %s1808_s28, %s1808_s28 }
  0x60   :  { %p1815_p4 = por %p1814_p3, %p1813_p2 }
  0x62   :  { %p1816_p5 = pnand %p1815_p4, %p1809_p1 }
  0x64   :  { %1819 = shalt.err (!%p1816_p5)
}
  0x65   :  { %93 = dma.hbm_to_vmem [thread:$0]  %s2081_s6, 1024, %s2005_s14, [#allocation13], %s1878_s17, %s1878_s17, %s1879_s18  }
  0x66   :  { %1864 = dma.done.wait [#allocation4], 1024  }
  0x67   :  { %1865 = vsyncadd [#allocation4], 4294966272 }
  0x68   :  { %1866 = dma.done.wait [#allocation7], 2048  }
  0x69   :  { %1867 = vsyncadd [#allocation7], 4294965248 }
  0x6a   :  { %1868 = dma.done.wait [#allocation10], 2048  }
  0x6b   :  { %1869 = vsyncadd [#allocation10], 4294965248 }
  0x6c   :  { %1870 = dma.done.wait [#allocation13], 1024  }
  0x6d   :  { %1871 = vsyncadd [#allocation13], 4294966272  ;;  %v1640_v0 = vld [vmem:[#allocation6] sm:$0xff]   ;;  %v1641_v1 = vld [vmem:[#allocation6 + $0x8] sm:$0xff]  }
  0x6e   :  { %1486 = vmatprep.subr.bf16.mxu0 %v1640_v0  ;;  %v1642_v2 = vld [vmem:[#allocation6 + $0x10] sm:$0xff]   ;;  %v1643_v3 = vld [vmem:[#allocation6 + $0x18] sm:$0xff]   ;;  %v1648_v4 = vld [vmem:[#allocation3] sm:$0xff]  }
  0x6f   :  { %1487 = vmatpush3.bf16.msra.mxu0 %v1640_v0  ;;  %1502 = vmatprep.mubr.bf16.mxu0 %v1648_v4  ;;  %v1644_v5 = vld [vmem:[#allocation6 + $0x20] sm:$0xff]   ;;  %v1645_v6 = vld [vmem:[#allocation6 + $0x28] sm:$0xff]   ;;  %v1646_v9 = vld [vmem:[#allocation6 + $0x30] sm:$0xff]  }
  0x70   :  { %1488 = vmatprep.subr.bf16.mxu0 %v1641_v1  ;;  %v1656_v7 = vld [vmem:[#allocation11] sm:$0xff]   ;;  %v1657_v8 = vld [vmem:[#allocation11 + $0x8] sm:$0xff]   ;;  %v1658_v10 = vld [vmem:[#allocation11 + $0x10] sm:$0xff]  }
  0x71   :  { %1518 = vmatprep.subr.bf16.mxu1 %v1656_v7  ;;  %v1647_v11 = vld [vmem:[#allocation6 + $0x38] sm:$0xff]   ;;  %v1664_v13 = vld [vmem:[#allocation8] sm:$0xff]   ;;  %v1649_v15 = vld [vmem:[#allocation3 + $0x8] sm:$0xff]  }
  0x72   :  { %1519 = vmatpush3.bf16.msra.mxu1 %v1656_v7  ;;  %v1659_v12 = vld [vmem:[#allocation11 + $0x18] sm:$0xff]   ;;  %1534 = vmatprep.mubr.bf16.mxu1 %v1664_v13  ;;  %v1660_v14 = vld [vmem:[#allocation11 + $0x20] sm:$0xff]   ;;  %v1650_v16 = vld [vmem:[#allocation3 + $0x10] sm:$0xff]  }
  0x73   :  { %1489 = vmatpush3.bf16.msra.mxu0 %v1641_v1  ;;  %1520 = vmatprep.subr.bf16.mxu1 %v1657_v8  ;;  %v1661_v17 = vld [vmem:[#allocation11 + $0x28] sm:$0xff]   ;;  %v1651_v18 = vld [vmem:[#allocation3 + $0x18] sm:$0xff]   ;;  %v1662_v19 = vld [vmem:[#allocation11 + $0x30] sm:$0xff]  }
  0x74   :  { %1490 = vmatprep.subr.bf16.mxu0 %v1642_v2  ;;  %v1652_v20 = vld [vmem:[#allocation3 + $0x20] sm:$0xff]   ;;  %v1663_v21 = vld [vmem:[#allocation11 + $0x38] sm:$0xff]   ;;  %v1653_v23 = vld [vmem:[#allocation3 + $0x28] sm:$0xff]  }
  0x75   :  { %v1665_v22 = vld [vmem:[#allocation9] sm:$0xff]   ;;  %v1666_v24 = vld [vmem:[#allocation8 + $0x8] sm:$0xff]   ;;  %v1654_v25 = vld [vmem:[#allocation3 + $0x30] sm:$0xff]  }
  0x76   :  { %1521 = vmatpush3.bf16.msra.mxu1 %v1657_v8  ;;  %v1667_v26 = vld [vmem:[#allocation9 + $0x8] sm:$0xff]   ;;  %v1668_v27 = vld [vmem:[#allocation8 + $0x10] sm:$0xff]   ;;  %v1655_v29 = vld [vmem:[#allocation3 + $0x38] sm:$0xff]  }
  0x77   :  { %1491 = vmatpush3.bf16.msra.mxu0 %v1642_v2  ;;  %1522 = vmatprep.subr.bf16.mxu1 %v1658_v10  ;;  %v1669_v28 = vld [vmem:[#allocation9 + $0x10] sm:$0xff]   ;;  %v1670_v30 = vld [vmem:[#allocation8 + $0x18] sm:$0xff]   ;;  %v1672_v31 = vld [vmem:[#allocation8 + $0x20] sm:$0xff]  }
  0x78   :  { %1492 = vmatprep.subr.bf16.mxu0 %v1643_v3  ;;  %v1671_v32 = vld [vmem:[#allocation9 + $0x18] sm:$0xff]   ;;  %v1673_v33 = vld [vmem:[#allocation9 + $0x20] sm:$0xff]   ;;  %v1674_v34 = vld [vmem:[#allocation8 + $0x28] sm:$0xff]  }
  0x79   :  { %v1676_v35 = vld [vmem:[#allocation8 + $0x30] sm:$0xff]   ;;  %v1675_v36 = vld [vmem:[#allocation9 + $0x28] sm:$0xff]   ;;  %v1678_v38 = vld [vmem:[#allocation8 + $0x38] sm:$0xff]  }
  0x7a   :  { %1523 = vmatpush3.bf16.msra.mxu1 %v1658_v10  ;;  %v1677_v37 = vld [vmem:[#allocation9 + $0x30] sm:$0xff]   ;;  %v1679_v39 = vld [vmem:[#allocation9 + $0x38] sm:$0xff]   ;;  %v1680_v40 = vld [vmem:[#allocation12] sm:$0xff]  }
  0x7b   :  { %1493 = vmatpush3.bf16.msra.mxu0 %v1643_v3  ;;  %1524 = vmatprep.subr.bf16.mxu1 %v1659_v12  ;;  %v1681_v41 = vld [vmem:[#allocation12 + $0x8] sm:$0xff]   ;;  %v1682_v42 = vld [vmem:[#allocation12 + $0x10] sm:$0xff]   ;;  %v1683_v43 = vld [vmem:[#allocation12 + $0x18] sm:$0xff]  }
  0x7c   :  { %1494 = vmatprep.subr.bf16.mxu0 %v1644_v5  ;;  %v1684_v44 = vld [vmem:[#allocation12 + $0x20] sm:$0xff]   ;;  %v1685_v45 = vld [vmem:[#allocation12 + $0x28] sm:$0xff]   ;;  %v1687_v7 = vld [vmem:[#allocation12 + $0x38] sm:$0xff]  }
  0x7d   :  { %v1255_v8 = vld [vmem:[%s2080_s5] ss:$0 sm:$0xff]  ;;  %s1884_s5 = smov [#allocation14]  }
  0x7e   :  { %1525 = vmatpush3.bf16.msra.mxu1 %v1659_v12  ;;  %s1184_s10 = sshll.u32 %s1884_s5, 4  ;;  %s1185_s10 = int_to_ptr.vmem [resolvable:$true] %s1184_s10 }
  0x7f   :  { %1495 = vmatpush3.bf16.msra.mxu0 %v1644_v5  ;;  %1526 = vmatprep.subr.bf16.mxu1 %v1660_v14  ;;  %s1820_s11 = scalar_lea.vmem %s1185_s10, 1024  ;;  %p1825_p7 = scmp.lt.s32.totalorder %s1185_s10, %s1185_s10 }
  0x80   :  { %1496 = vmatprep.subr.bf16.mxu0 %v1645_v6  ;;  %p1821_p6 = scmp.ne.s32.totalorder %s1185_s10, %s1820_s11  ;;  %p1826_p8 = scmp.lt.s32.totalorder %s1820_s11, %s1820_s11 }
  0x82   :  { %1527 = vmatpush3.bf16.msra.mxu1 %v1660_v14  ;;  %p1827_p9 = por %p1826_p8, %p1825_p7 }
  0x83   :  { %1497 = vmatpush3.bf16.msra.mxu0 %v1645_v6  ;;  %1528 = vmatprep.subr.bf16.mxu1 %v1661_v17  ;;  %v1686_v6 = vld [vmem:[#allocation12 + $0x30] sm:$0xff]  }
  0x84   :  { %1498 = vmatprep.subr.bf16.mxu0 %v1646_v9  ;;  %p1828_p10 = pnand %p1827_p9, %p1821_p6 }
  0x86   :  { %1529 = vmatpush3.bf16.msra.mxu1 %v1661_v17 }
  0x87   :  { %1499 = vmatpush3.bf16.msra.mxu0 %v1646_v9  ;;  %1530 = vmatprep.subr.bf16.mxu1 %v1662_v19 }
  0x88   :  { %1500 = vmatprep.subr.bf16.mxu0 %v1647_v11 }
  0x8a   :  { %1531 = vmatpush3.bf16.msra.mxu1 %v1662_v19 }
  0x8b   :  { %1501 = vmatpush3.bf16.msra.mxu0 %v1647_v11  ;;  %1532 = vmatprep.subr.bf16.mxu1 %v1663_v21 }
  0x8c   :  { %1582 = vmatprep.subr.bf16.mxu0 %v1680_v40 }
  0x8e   :  { %1503 = vmatmul.mubr.bf16.vlgmr.msra.gmra.mrb[0].mxu0 %v1649_v15  ;;  %1533 = vmatpush3.bf16.msra.mxu1 %v1663_v21 }
  0x8f   :  { %1506 = vmatprep.mubr.bf16.mxu0 %v1650_v16  ;;  %1550 = vmatprep.subr.bf16.mxu1 %v1665_v22 }
  0x90   :  { %1583 = vmatpush3.bf16.msra.mxu0 %v1680_v40 }
  0x91   :  { %1535 = vmatmul.mubr.bf16.vlgmr.msra.gmra.mrb[0].mxu1 %v1666_v24  ;;  %1584 = vmatprep.subr.bf16.mxu0 %v1681_v41 }
  0x92   :  { %1551 = vmatpush3.bf16.msra.mxu1 %v1665_v22  ;;  %1538 = vmatprep.mubr.bf16.mxu1 %v1668_v27 }
  0x93   :  { %1552 = vmatprep.subr.bf16.mxu1 %v1667_v26 }
  0x94   :  { %1585 = vmatpush3.bf16.msra.mxu0 %v1681_v41 }
  0x95   :  { %1586 = vmatprep.subr.bf16.mxu0 %v1682_v42 }
  0x96   :  { %1507 = vmatmul.mubr.bf16.gmra.mrb[4].mxu0 %v1651_v18  ;;  %1553 = vmatpush3.bf16.msra.mxu1 %v1667_v26 }
  0x97   :  { %1510 = vmatprep.mubr.bf16.mxu0 %v1652_v20  ;;  %1554 = vmatprep.subr.bf16.mxu1 %v1669_v28 }
  0x98   :  { %1587 = vmatpush3.bf16.msra.mxu0 %v1682_v42 }
  0x99   :  { %1539 = vmatmul.mubr.bf16.gmra.mrb[4].mxu1 %v1670_v30  ;;  %1588 = vmatprep.subr.bf16.mxu0 %v1683_v43 }
  0x9a   :  { %1555 = vmatpush3.bf16.msra.mxu1 %v1669_v28  ;;  %1542 = vmatprep.mubr.bf16.mxu1 %v1672_v31 }
  0x9b   :  { %1556 = vmatprep.subr.bf16.mxu1 %v1671_v32 }
  0x9c   :  { %1589 = vmatpush3.bf16.msra.mxu0 %v1683_v43 }
  0x9d   :  { %1590 = vmatprep.subr.bf16.mxu0 %v1684_v44 }
  0x9e   :  { %1511 = vmatmul.mubr.bf16.gmra.mrb[8].mxu0 %v1653_v23  ;;  %1557 = vmatpush3.bf16.msra.mxu1 %v1671_v32 }
  0x9f   :  { %1514 = vmatprep.mubr.bf16.mxu0 %v1654_v25  ;;  %1558 = vmatprep.subr.bf16.mxu1 %v1673_v33 }
  0xa0   :  { %1591 = vmatpush3.bf16.msra.mxu0 %v1684_v44 }
  0xa1   :  { %1543 = vmatmul.mubr.bf16.gmra.mrb[8].mxu1 %v1674_v34  ;;  %1592 = vmatprep.subr.bf16.mxu0 %v1685_v45 }
  0xa2   :  { %1559 = vmatpush3.bf16.msra.mxu1 %v1673_v33  ;;  %1546 = vmatprep.mubr.bf16.mxu1 %v1676_v35 }
  0xa3   :  { %1560 = vmatprep.subr.bf16.mxu1 %v1675_v36 }
  0xa4   :  { %1593 = vmatpush3.bf16.msra.mxu0 %v1685_v45 }
  0xa5   :  { %1594 = vmatprep.subr.bf16.mxu0 %v1686_v6 }
  0xa6   :  { %1515 = vmatmul.mubr.bf16.gmra.mrb[12].mxu0 %v1655_v29  ;;  %1561 = vmatpush3.bf16.msra.mxu1 %v1675_v36 }
  0xa7   :  { %1562 = vmatprep.subr.bf16.mxu1 %v1677_v37 }
  0xa8   :  { %1595 = vmatpush3.bf16.msra.mxu0 %v1686_v6 }
  0xa9   :  { %1547 = vmatmul.mubr.bf16.gmra.mrb[12].mxu1 %v1678_v38  ;;  %1596 = vmatprep.subr.bf16.mxu0 %v1687_v7 }
  0xaa   :  { %1563 = vmatpush3.bf16.msra.mxu1 %v1677_v37 }
  0xab   :  { %1564 = vmatprep.subr.bf16.mxu1 %v1679_v39 }
  0xac   :  { %1597 = vmatpush3.bf16.msra.mxu0 %v1687_v7 }
  0xae   :  { %1565 = vmatpush3.bf16.msra.mxu1 %v1679_v39 }
 0x161   :  { %v1504_v46 = vpop.f32.mrb[0].mxu0 }
 0x162   :  { %v311_v47 = vpop.f32.mrb[1].mxu0 }
 0x163   :  { %v1505_v48 = vpop.f32.mrb[2].mxu0 }
 0x164   :  { %v426_v49 = vpack.c.bf16 %v1505_v48, %v1504_v46  ;;  %v314_v50 = vpop.f32.mrb[3].mxu0 }
 0x165   :  { %v425_v51 = vpack.c.bf16 %v314_v50, %v311_v47 }
 0x167   :  { %1566 = vmatprep.mubr.bf16.mxu1 %v425_v51 }
 0x168   :  { %1567 = vmatmul.mubr.bf16.vlgmr.msra.gmra.mrb[0].mxu1 %v426_v49 }
 0x169   :  { %v1508_v52 = vpop.f32.mrb[4].mxu0 }
 0x16a   :  { %v327_v53 = vpop.f32.mrb[5].mxu0 }
 0x16b   :  { %v1509_v54 = vpop.f32.mrb[6].mxu0 }
 0x16c   :  { %v428_v55 = vpack.c.bf16 %v1509_v54, %v1508_v52  ;;  %v330_v56 = vpop.f32.mrb[7].mxu0 }
 0x16d   :  { %v427_v57 = vpack.c.bf16 %v330_v56, %v327_v53 }
 0x16f   :  { %1570 = vmatprep.mubr.bf16.mxu1 %v427_v57 }
 0x170   :  { %1571 = vmatmul.mubr.bf16.gmra.mrb[4].mxu1 %v428_v55 }
 0x171   :  { %v1512_v58 = vpop.f32.mrb[8].mxu0 }
 0x172   :  { %v343_v59 = vpop.f32.mrb[9].mxu0 }
 0x173   :  { %v1513_v60 = vpop.f32.mrb[10].mxu0 }
 0x174   :  { %v430_v61 = vpack.c.bf16 %v1513_v60, %v1512_v58  ;;  %v346_v62 = vpop.f32.mrb[11].mxu0 }
 0x175   :  { %v429_v63 = vpack.c.bf16 %v346_v62, %v343_v59 }
 0x177   :  { %1574 = vmatprep.mubr.bf16.mxu1 %v429_v63 }
 0x178   :  { %1575 = vmatmul.mubr.bf16.gmra.mrb[8].mxu1 %v430_v61 }
 0x179   :  { %v1516_v0 = vpop.f32.mrb[12].mxu0 }
 0x17a   :  { %v359_v1 = vpop.f32.mrb[13].mxu0 }
 0x17b   :  { %v1517_v2 = vpop.f32.mrb[14].mxu0 }
 0x17c   :  { %v432_v3 = vpack.c.bf16 %v1517_v2, %v1516_v0  ;;  %v362_v4 = vpop.f32.mrb[15].mxu0 }
 0x17d   :  { %v431_v5 = vpack.c.bf16 %v362_v4, %v359_v1 }
 0x17f   :  { %1578 = vmatprep.mubr.bf16.mxu1 %v431_v5 }
 0x180   :  { %1579 = vmatmul.mubr.bf16.gmra.mrb[12].mxu1 %v432_v3 }
 0x23b   :  { %v1568_v9 = vpop.f32.mrb[0].mxu1 }
 0x23c   :  { %v828_v10 = vadd.f32 %v1568_v9, %v1255_v8  ;;  %v756_v11 = vpop.f32.mrb[1].mxu1 }
 0x23d   :  { %v826_v12 = vadd.f32 %v1255_v8, %v756_v11  ;;  %v1569_v13 = vpop.f32.mrb[2].mxu1 }
 0x23e   :  { %v829_v14 = vadd.f32 %v1569_v13, %v1255_v8  ;;  %v759_v15 = vpop.f32.mrb[3].mxu1  ;;  %v844_v17 = vmax.f32 %v828_v10, 0.0 }
 0x23f   :  { %v827_v16 = vadd.f32 %v1255_v8, %v759_v15  ;;  %v842_v19 = vmax.f32 %v826_v12, 0.0 }
 0x240   :  { %v845_v18 = vmax.f32 %v829_v14, 0.0 }
 0x241   :  { %v843_v20 = vmax.f32 %v827_v16, 0.0 }
 0x242   :  { %v859_v21 = vpack.c.bf16 %v845_v18, %v844_v17 }
 0x243   :  { %v858_v22 = vpack.c.bf16 %v843_v20, %v842_v19  ;;  %v1572_v23 = vpop.f32.mrb[4].mxu1 }
 0x244   :  { %1408 = vst [vmem:[#allocation14 + $0x8] sm:$0xff] %v859_v21   ;;  %v832_v24 = vadd.f32 %v1572_v23, %v1255_v8  ;;  %v772_v25 = vpop.f32.mrb[5].mxu1 }
 0x245   :  { %1332 = vst [vmem:[#allocation14] sm:$0xff] %v858_v22   ;;  %v830_v26 = vadd.f32 %v1255_v8, %v772_v25  ;;  %v1573_v27 = vpop.f32.mrb[6].mxu1  ;;  %1598 = vmatprep.mubr.bf16.mxu0 %v858_v22 }
 0x246   :  { %v833_v28 = vadd.f32 %v1573_v27, %v1255_v8  ;;  %v775_v29 = vpop.f32.mrb[7].mxu1  ;;  %1599 = vmatmul.mubr.bf16.vlgmr.msra.gmra.mrb[16].mxu0 %v859_v21  ;;  %v848_v31 = vmax.f32 %v832_v24, 0.0 }
 0x247   :  { %v831_v30 = vadd.f32 %v1255_v8, %v775_v29  ;;  %v846_v33 = vmax.f32 %v830_v26, 0.0 }
 0x248   :  { %v849_v32 = vmax.f32 %v833_v28, 0.0 }
 0x249   :  { %v847_v34 = vmax.f32 %v831_v30, 0.0 }
 0x24a   :  { %v861_v35 = vpack.c.bf16 %v849_v32, %v848_v31 }
 0x24b   :  { %v860_v36 = vpack.c.bf16 %v847_v34, %v846_v33  ;;  %v1576_v37 = vpop.f32.mrb[8].mxu1 }
 0x24c   :  { %1410 = vst [vmem:[#allocation14 + $0x18] sm:$0xff] %v861_v35   ;;  %v836_v38 = vadd.f32 %v1576_v37, %v1255_v8  ;;  %v788_v39 = vpop.f32.mrb[9].mxu1 }
 0x24d   :  { %1409 = vst [vmem:[#allocation14 + $0x10] sm:$0xff] %v860_v36   ;;  %v834_v40 = vadd.f32 %v1255_v8, %v788_v39  ;;  %v1577_v41 = vpop.f32.mrb[10].mxu1  ;;  %1602 = vmatprep.mubr.bf16.mxu0 %v860_v36 }
 0x24e   :  { %v837_v42 = vadd.f32 %v1577_v41, %v1255_v8  ;;  %v791_v43 = vpop.f32.mrb[11].mxu1  ;;  %1603 = vmatmul.mubr.bf16.gmra.mrb[20].mxu0 %v861_v35  ;;  %v852_v45 = vmax.f32 %v836_v38, 0.0 }
 0x24f   :  { %v835_v44 = vadd.f32 %v1255_v8, %v791_v43  ;;  %v850_v47 = vmax.f32 %v834_v40, 0.0 }
 0x250   :  { %v853_v46 = vmax.f32 %v837_v42, 0.0 }
 0x251   :  { %v851_v48 = vmax.f32 %v835_v44, 0.0 }
 0x252   :  { %v863_v49 = vpack.c.bf16 %v853_v46, %v852_v45 }
 0x253   :  { %v862_v50 = vpack.c.bf16 %v851_v48, %v850_v47  ;;  %v1580_v51 = vpop.f32.mrb[12].mxu1 }
 0x254   :  { %1412 = vst [vmem:[#allocation14 + $0x28] sm:$0xff] %v863_v49   ;;  %v840_v52 = vadd.f32 %v1580_v51, %v1255_v8  ;;  %v804_v53 = vpop.f32.mrb[13].mxu1 }
 0x255   :  { %1411 = vst [vmem:[#allocation14 + $0x20] sm:$0xff] %v862_v50   ;;  %v838_v54 = vadd.f32 %v1255_v8, %v804_v53  ;;  %v1581_v55 = vpop.f32.mrb[14].mxu1  ;;  %1606 = vmatprep.mubr.bf16.mxu0 %v862_v50 }
 0x256   :  { %v841_v56 = vadd.f32 %v1581_v55, %v1255_v8  ;;  %v807_v57 = vpop.f32.mrb[15].mxu1  ;;  %1607 = vmatmul.mubr.bf16.gmra.mrb[24].mxu0 %v863_v49  ;;  %v856_v59 = vmax.f32 %v840_v52, 0.0 }
 0x257   :  { %v839_v58 = vadd.f32 %v1255_v8, %v807_v57  ;;  %v854_v61 = vmax.f32 %v838_v54, 0.0 }
 0x258   :  { %v857_v60 = vmax.f32 %v841_v56, 0.0 }
 0x259   :  { %v855_v62 = vmax.f32 %v839_v58, 0.0 }
 0x25a   :  { %v865_v63 = vpack.c.bf16 %v857_v60, %v856_v59 }
 0x25b   :  { %v864_v0 = vpack.c.bf16 %v855_v62, %v854_v61 }
 0x25c   :  { %1414 = vst [vmem:[#allocation14 + $0x38] sm:$0xff] %v865_v63  }
 0x25d   :  { %1413 = vst [vmem:[#allocation14 + $0x30] sm:$0xff] %v864_v0   ;;  %1610 = vmatprep.mubr.bf16.mxu0 %v864_v0 }
 0x25e   :  { %1611 = vmatmul.mubr.bf16.gmra.mrb[28].mxu0 %v865_v63 }
 0x25f   :  { %1831 = shalt.err (!%p1828_p10)
}
 0x260   :  { %s1832_s15 = scalar_lea.hbm %s2082_s7, 1024 }
 0x261   :  { %p1833_p11 = scmp.ne.s32.totalorder %s2082_s7, %s1832_s15  ;;  %p1836_p12 = scmp.lt.u32.totalorder %s1832_s15, %s2082_s7 }
 0x263   :  { %p1838_p13 = pnand %p1836_p12, %p1833_p11 }
 0x265   :  { %1841 = shalt.err (!%p1838_p13)
}
 0x266   :  { %1190 = dma.vmem_to_hbm [thread:$0]  %s1185_s10, 1024, %s2082_s7, [#allocation5], %s1878_s17, %s1878_s17, %s1879_s18  }
 0x267   :  { %s1885_s7 = smov [#allocation15]  }
 0x268   :  { %s1196_s2 = sshll.u32 %s1885_s7, 4  ;;  %s1197_s2 = int_to_ptr.vmem [resolvable:$true] %s1196_s2 }
 0x269   :  { %s1842_s12 = scalar_lea.vmem %s1197_s2, 1024  ;;  %p1847_p1 = scmp.lt.s32.totalorder %s1197_s2, %s1197_s2 }
 0x26a   :  { %p1843_p0 = scmp.ne.s32.totalorder %s1197_s2, %s1842_s12  ;;  %p1848_p2 = scmp.lt.s32.totalorder %s1842_s12, %s1842_s12 }
 0x26c   :  { %p1849_p3 = por %p1848_p2, %p1847_p1 }
 0x26e   :  { %p1850_p4 = pnand %p1849_p3, %p1843_p0 }
 0x319   :  { %v1600_v1 = vpop.f32.mrb[16].mxu0 }
 0x31a   :  { %v1036_v2 = vpop.f32.mrb[17].mxu0 }
 0x31b   :  { %v1601_v3 = vpop.f32.mrb[18].mxu0 }
 0x31c   :  { %v1376_v4 = vpack.c.bf16 %v1601_v3, %v1600_v1  ;;  %v1039_v5 = vpop.f32.mrb[19].mxu0 }
 0x31d   :  { %v1371_v6 = vpack.c.bf16 %v1039_v5, %v1036_v2 }
 0x31e   :  { %1415 = vst [vmem:[#allocation15 + $0x8] sm:$0xff] %v1376_v4  }
 0x31f   :  { %1372 = vst [vmem:[#allocation15] sm:$0xff] %v1371_v6  }
 0x321   :  { %v1604_v7 = vpop.f32.mrb[20].mxu0 }
 0x322   :  { %v1052_v8 = vpop.f32.mrb[21].mxu0 }
 0x323   :  { %v1605_v9 = vpop.f32.mrb[22].mxu0 }
 0x324   :  { %v1386_v10 = vpack.c.bf16 %v1605_v9, %v1604_v7  ;;  %v1055_v11 = vpop.f32.mrb[23].mxu0 }
 0x325   :  { %v1381_v12 = vpack.c.bf16 %v1055_v11, %v1052_v8 }
 0x326   :  { %1417 = vst [vmem:[#allocation15 + $0x18] sm:$0xff] %v1386_v10  }
 0x327   :  { %1416 = vst [vmem:[#allocation15 + $0x10] sm:$0xff] %v1381_v12  }
 0x329   :  { %v1608_v13 = vpop.f32.mrb[24].mxu0 }
 0x32a   :  { %v1068_v14 = vpop.f32.mrb[25].mxu0 }
 0x32b   :  { %v1609_v15 = vpop.f32.mrb[26].mxu0 }
 0x32c   :  { %v1396_v16 = vpack.c.bf16 %v1609_v15, %v1608_v13  ;;  %v1071_v17 = vpop.f32.mrb[27].mxu0 }
 0x32d   :  { %v1391_v18 = vpack.c.bf16 %v1071_v17, %v1068_v14 }
 0x32e   :  { %1419 = vst [vmem:[#allocation15 + $0x28] sm:$0xff] %v1396_v16  }
 0x32f   :  { %1418 = vst [vmem:[#allocation15 + $0x20] sm:$0xff] %v1391_v18  }
 0x331   :  { %v1612_v19 = vpop.f32.mrb[28].mxu0 }
 0x332   :  { %v1084_v20 = vpop.f32.mrb[29].mxu0 }
 0x333   :  { %v1613_v21 = vpop.f32.mrb[30].mxu0 }
 0x334   :  { %v1406_v22 = vpack.c.bf16 %v1613_v21, %v1612_v19  ;;  %v1087_v23 = vpop.f32.mrb[31].mxu0 }
 0x335   :  { %v1401_v24 = vpack.c.bf16 %v1087_v23, %v1084_v20 }
 0x336   :  { %1421 = vst [vmem:[#allocation15 + $0x38] sm:$0xff] %v1406_v22  }
 0x337   :  { %1420 = vst [vmem:[#allocation15 + $0x30] sm:$0xff] %v1401_v24  }
 0x338   :  { %1853 = shalt.err (!%p1850_p4)
}
 0x339   :  { %s1854_s24 = scalar_lea.hbm %s2083_s8, 1024 }
 0x33a   :  { %p1855_p5 = scmp.ne.s32.totalorder %s2083_s8, %s1854_s24  ;;  %p1858_p6 = scmp.lt.u32.totalorder %s1854_s24, %s2083_s8 }
 0x33c   :  { %p1860_p7 = pnand %p1858_p6, %p1855_p5 }
 0x33e   :  { %1863 = shalt.err (!%p1860_p7)
}
 0x33f   :  { %1202 = dma.vmem_to_hbm [thread:$0]  %s1197_s2, 1024, %s2083_s8, [#allocation16], %s1878_s17, %s1878_s17, %s1879_s18  }
 0x340   :  { %1872 = dma.done.wait [#allocation5], 1024  }
 0x341   :  { %1873 = vsyncadd [#allocation5], 4294966272 }
 0x342   :  { %1874 = dma.done.wait [#allocation16], 1024  }
 0x343   :  { %1875 = vsyncadd [#allocation16], 4294966272 }
 0x344   :  { %1209 = vsyncpa [#allocation4], 1 }
 0x345   :  { %1210 = vsyncpa [#allocation7], 1 }
 0x346   :  { %1211 = vsyncpa [#allocation10], 1 }
 0x347   :  { %1212 = vsyncpa [#allocation13], 1 }
 0x348   :  { %1213 = vsyncpa [#allocation5], 1 }
 0x349   :  { %1214 = vsyncpa [#allocation16], 1 }

</bundles_post_ra>
